<compile_context>
chip_gen: v7x
topology: tpu7x:2x2x1
jax: 0.10.0
libtpu: 0.0.40
codegen_flags: <defaults>
</compile_context>

<pallas_src>
import functools
import math

import jax
import jax.numpy as jnp
from jax.experimental import pallas as pl
from jax.experimental.pallas import tpu as pltpu


def _round_up(x, m):
    return ((x + m - 1) // m) * m


# ------------------------------- Pallas kernel -------------------------------

def _embed_gather_kernel(ids_ref, table_hbm, o_ref, buf, sem, *, scale):
    # ids_ref:   (m_pad,)           int32 token ids, resident in SMEM (scalar prefetch)
    # table_hbm: (vocab, d_model)   embedding table, left in HBM (pl.ANY)
    # o_ref:     (tile_m, d_model)  output block (auto-pipelined by Pallas)
    # buf:       (tile_m, d_model)  VMEM scratch holding the gathered rows
    # sem:       single DMA semaphore shared by all row copies of this tile
    tile_m, _ = o_ref.shape
    vocab = table_hbm.shape[0]
    base = pl.program_id(0) * tile_m

    # Issue one row-DMA per token of this tile; all copies stay in flight at once.
    @pl.loop(0, tile_m)
    def _issue(j):
        row = ids_ref[base + j]
        row = jnp.minimum(jnp.maximum(row, 0), vocab - 1)  # clamp like jnp gather
        pltpu.make_async_copy(table_hbm.at[pl.ds(row, 1)],
                              buf.at[pl.ds(j, 1)],
                              sem).start()

    # Wait for all tile_m row copies (each wait consumes one row's worth of signal).
    @pl.loop(0, tile_m)
    def _wait(j):
        pltpu.make_async_copy(table_hbm.at[pl.ds(0, 1)],
                              buf.at[pl.ds(0, 1)],
                              sem).wait()

    # Fused sqrt(d_model) scale; f32 math, cast back to the table dtype.
    o_ref[...] = (buf[...].astype(jnp.float32) * scale).astype(o_ref.dtype)


# ------------------------------ Pallas wrapper -------------------------------

def embeddings_pallas(ids, table, *, tile_m=256):
    """Embedding lookup + sqrt(d_model) scale.

    ids: integer array of any shape; table: (vocab, d_model).
    Returns an array of shape ids.shape + (d_model,) in table.dtype.
    """
    vocab, d_model = table.shape
    scale = math.sqrt(float(d_model))

    lead_shape = ids.shape
    m = int(math.prod(lead_shape)) if lead_shape else 1
    ids_flat = ids.reshape(m).astype(jnp.int32)

    # Row tile: multiple of 8, no larger than the (8-padded) token count.
    tile_m = max(8, min(_round_up(int(tile_m), 8), _round_up(m, 8)))
    m_pad = _round_up(m, tile_m)
    if m_pad != m:
        ids_flat = jnp.pad(ids_flat, (0, m_pad - m))  # pad with token 0 (valid row)

    grid = (m_pad // tile_m,)

    # Actual VMEM working set: gather scratch + double-buffered output tile.
    itemsize = jnp.dtype(table.dtype).itemsize
    tile_bytes = tile_m * d_model * itemsize
    vmem_limit = int(min(32 * 2**20, max(8 * 2**20, 8 * tile_bytes)))

    kernel = functools.partial(_embed_gather_kernel, scale=scale)

    out = pl.pallas_call(
        kernel,
        out_shape=jax.ShapeDtypeStruct((m_pad, d_model), table.dtype),
        grid_spec=pltpu.PrefetchScalarGridSpec(
            num_scalar_prefetch=1,                        # ids -> SMEM before the grid runs
            grid=grid,
            in_specs=[pl.BlockSpec(memory_space=pl.ANY)],  # table stays in HBM
            out_specs=pl.BlockSpec((tile_m, d_model), lambda i, ids: (i, 0)),
            scratch_shapes=[
                pltpu.VMEM((tile_m, d_model), table.dtype),
                pltpu.SemaphoreType.DMA(()),
            ]),
        compiler_params=pltpu.CompilerParams(
            dimension_semantics=("parallel",),            # megacore splits the token range
            vmem_limit_bytes=vmem_limit),
    )(ids_flat, table)

    out = out[:m]
    return out.reshape(*lead_shape, d_model)


# ----------------------------- pure-JAX reference ----------------------------

def embeddings_ref(ids, table):
    d_model = table.shape[1]
    return table[ids] * math.sqrt(float(d_model))


# ----------------------------------- main ------------------------------------

if __name__ == "__main__":
    key = jax.random.PRNGKey(0)
    k_tab, k_ids, k_tab2, k_ids2 = jax.random.split(key, 4)

    # Small config matching the module (batch=2, seq=8, d_model=32, vocab=128).
    VOCAB, D_MODEL = 128, 32
    B, S = 2, 8
    table = jax.random.normal(k_tab, (VOCAB, D_MODEL), jnp.float32)
    ids = jax.random.randint(k_ids, (B, S), 0, VOCAB, dtype=jnp.int32)

    out = jax.block_until_ready(jax.jit(embeddings_pallas)(ids, table))
    ref = embeddings_ref(ids, table)
    assert out.shape == (B, S, D_MODEL), out.shape
    assert jnp.allclose(out, ref, atol=1e-4, rtol=1e-4), \
        float(jnp.max(jnp.abs(out - ref)))

    # Second config exercising a multi-tile grid + ragged padding path.
    VOCAB2, D2 = 1000, 256
    B2, S2 = 2, 100                      # m=200 -> tile_m=64 -> m_pad=256, grid=(4,)
    table2 = jax.random.normal(k_tab2, (VOCAB2, D2), jnp.float32)
    ids2 = jax.random.randint(k_ids2, (B2, S2), 0, VOCAB2, dtype=jnp.int32)

    fwd2 = jax.jit(lambda i, t: embeddings_pallas(i, t, tile_m=64))
    out2 = jax.block_until_ready(fwd2(ids2, table2))
    ref2 = embeddings_ref(ids2, table2)
    assert out2.shape == (B2, S2, D2), out2.shape
    assert jnp.allclose(out2, ref2, atol=1e-4, rtol=1e-4), \
        float(jnp.max(jnp.abs(out2 - ref2)))

    print("KERNEL_OK")
</pallas_src>

<mosaic_0001>
module attributes {stable_mosaic.version = 11 : i64} {
  func.func @_embed_gather_kernel(%arg0: i32, %arg1: memref<16xi32, #tpu.memory_space<smem>>, %arg2: memref<128x32xf32, #tpu.memory_space<any>>, %arg3: memref<16x32xf32, #tpu.memory_space<vmem>>, %arg4: memref<16x32xf32, #tpu.memory_space<vmem>>, %arg5: memref<!tpu.dma_semaphore, #tpu.memory_space<semaphore_mem>>) attributes {dimension_semantics = [#tpu.dimension_semantics<parallel>], iteration_bounds = array<i64: 1>, scalar_prefetch = 1 : i64, scratch_operands = 2 : i64, tpu.core_type = #tpu.core_type<tc>, window_params = [{}, {transform_indices = @transform_1, window_bounds = array<i64: 16, 32>}]} {
    %c16_i32 = arith.constant 16 : i32
    %0 = arith.muli %arg0, %c16_i32 : i32
    %c0_i32 = arith.constant 0 : i32
    %c16_i32_0 = arith.constant 16 : i32
    %1 = arith.addi %c0_i32, %c16_i32_0 : i32
    %c1_i32 = arith.constant 1 : i32
    scf.for %arg6 = %c0_i32 to %1 step %c1_i32  : i32 {
      %c1_i32_8 = arith.constant 1 : i32
      %7 = arith.muli %arg6, %c1_i32_8 : i32
      %c0_i32_9 = arith.constant 0 : i32
      %8 = arith.addi %c0_i32_9, %7 : i32
      %9 = arith.addi %0, %8 : i32
      %10 = arith.index_cast %9 : i32 to index
      %11 = memref.load %arg1[%10] : memref<16xi32, #tpu.memory_space<smem>>
      %c0_i32_10 = arith.constant 0 : i32
      %12 = arith.maxsi %11, %c0_i32_10 : i32
      %c127_i32 = arith.constant 127 : i32
      %13 = arith.minsi %12, %c127_i32 : i32
      %c0_i32_11 = arith.constant 0 : i32
      %14 = tpu.memref_slice %arg2[%13, %c0_i32_11] : memref<128x32xf32, #tpu.memory_space<any>> -> memref<1x32xf32, #tpu.memory_space<any>>
      %c0_i32_12 = arith.constant 0 : i32
      %15 = tpu.memref_slice %arg4[%8, %c0_i32_12] : memref<16x32xf32, #tpu.memory_space<vmem>> -> memref<1x32xf32, #tpu.memory_space<vmem>>
      tpu.enqueue_dma source(%14 : memref<1x32xf32, #tpu.memory_space<any>>) target(%15 : memref<1x32xf32, #tpu.memory_space<vmem>>) target_semaphore(%arg5 : memref<!tpu.dma_semaphore, #tpu.memory_space<semaphore_mem>>)
    }
    %c16_i32_1 = arith.constant 16 : i32
    %c0_i32_2 = arith.constant 0 : i32
    %c16_i32_3 = arith.constant 16 : i32
    %2 = arith.addi %c0_i32_2, %c16_i32_3 : i32
    %c1_i32_4 = arith.constant 1 : i32
    scf.for %arg6 = %c0_i32_2 to %2 step %c1_i32_4  : i32 {
      %c0_i32_8 = arith.constant 0 : i32
      %c0_i32_9 = arith.constant 0 : i32
      %7 = tpu.memref_slice %arg2[%c0_i32_8, %c0_i32_9] : memref<128x32xf32, #tpu.memory_space<any>> -> memref<1x32xf32, #tpu.memory_space<any>>
      %c0_i32_10 = arith.constant 0 : i32
      %c0_i32_11 = arith.constant 0 : i32
      %8 = tpu.memref_slice %arg4[%c0_i32_10, %c0_i32_11] : memref<16x32xf32, #tpu.memory_space<vmem>> -> memref<1x32xf32, #tpu.memory_space<vmem>>
      tpu.wait_dma2 semaphore(%arg5 : memref<!tpu.dma_semaphore, #tpu.memory_space<semaphore_mem>>) src(%7 : memref<1x32xf32, #tpu.memory_space<any>>) dst(%8 : memref<1x32xf32, #tpu.memory_space<vmem>>)
    }
    %c0 = arith.constant 0 : index
    %c0_5 = arith.constant 0 : index
    %3 = vector.load %arg4[%c0, %c0_5] : memref<16x32xf32, #tpu.memory_space<vmem>>, vector<16x32xf32>
    %cst = arith.constant 5.65685415 : f32
    %4 = vector.broadcast %cst : f32 to vector<16x32xf32>
    %5 = arith.mulf %3, %4 : vector<16x32xf32>
    %c0_6 = arith.constant 0 : index
    %c0_7 = arith.constant 0 : index
    %6 = vector.load %arg3[%c0_6, %c0_7] : memref<16x32xf32, #tpu.memory_space<vmem>>, vector<16x32xf32>
    tpu.vector_store %arg3[%c0_6, %c0_7], %5 {strides = array<i32>} : memref<16x32xf32, #tpu.memory_space<vmem>>, vector<16x32xf32>,
    return
  }
  func.func @transform_1(%arg0: i32, %arg1: memref<16xi32, #tpu.memory_space<smem>>) -> (i32, i32) {
    %c0_i32 = arith.constant 0 : i32
    %c0_i32_0 = arith.constant 0 : i32
    return %arg0, %c0_i32 : i32, i32
  }
}

</mosaic_0001>

<bundles_post_ra>
// kernel: embeddings_pallas.1
= control target key start
LH: loop header
LB: loop body
LE: loop exit
PB: predicated region body
PF: predicated region fallthrough
CT: control target
= control target key end

     0   :  { %s254_s0 = inlined_call_operand.vmem [shape: s32[16], index: 0, kind: input, shape index: {}]   ;;  %s255_s1 = inlined_call_operand.vmem [shape: f32[128,32], index: 1, kind: input, shape index: {}]   ;;  %s256_s2 = inlined_call_operand.hbm [shape: f32[16,32], index: 2, kind: output, shape index: {}]  }
   0x1   :  { %s7_s11 = sshll.u32 %s254_s0, 4  ;;  %s8_s11 = int_to_ptr.vmem [resolvable:$true] %s7_s11 }
   0x2   :  { %s161_s12 = scalar_lea.vmem %s8_s11, 16  ;;  %p166_p1 = scmp.lt.s32.totalorder %s8_s11, %s8_s11 }
   0x3   :  { %p162_p0 = scmp.ne.s32.totalorder %s8_s11, %s161_s12  ;;  %p167_p2 = scmp.lt.s32.totalorder %s161_s12, %s161_s12 }
   0x5   :  { %p168_p3 = por %p167_p2, %p166_p1 }
   0x7   :  { %p169_p4 = pnand %p168_p3, %p162_p0 }
   0x9   :  { %172 = shalt.err (!%p169_p4)  }
   0xa   :  { %s217_s13 = smov [#allocation5]  }
   0xb   :  { %10 = dma.vmem_to_smem %s8_s11, 16, %s217_s13, [#allocation4] }
   0xc   :  { %203 = dma.done.wait [#allocation4], 16 }
   0xd   :  { %204 = vsyncadd [#allocation4], 4294967280 }
   0xe   :  { %12 = sfence }
   0xf   :  { %13 = vsyncpa [#allocation7], 0  ;;  %s209_s14 = smov 0  }
  0x10 LB: > { %s22_s15 = sld [smem:[#allocation5 + %s211_s14]]  ;;  %s28_s18 = scalar_lea.vmem [#allocation2], %s211_s14  ;;  %s211_s14 = sphi %s209_s14, %s20_s14  }
  0x16   : > { %p23_p5 = scmp.gt.s32.totalorder %s22_s15, 0  ;;  %p133_p6 = scmp.lt.s32.totalorder %s22_s15, 127 }
  0x18   : > { %s258_s15 = smov (!%p23_p5, %s22_s15), 0 }
  0x19   : > { %s260_s15 = smov (!%p133_p6, %s258_s15), 127 }
  0x1a   : > { %s27_s17 = scalar_lea.vmem %s255_s1, %s260_s15 }
  0x1b   : > { %v46_v0 = vld [vmem:[%s27_s17] sm:$0x1] }
  0x1c   : > { %47 = vst [vmem:[%s28_s18] sm:$0x1] %v46_v0 }
  0x1d   : > { %72 = vsyncadd [#allocation3], 16  ;;  %s20_s14 = sadd.s32 1, %s211_s14  }
  0x1e   : > { %p17_p7 = scmp.ge.s32.totalorder %s20_s14, 16  }
  0x1f   :  { %s213_s19 = smov (%p17_p7), 0  }
  0x20   :  { %19 = sbr.rel (!%p17_p7) target bundleno = 16 (0x10), region = 76 }
  0x27 LB: > { %205 = dma.done.wait [#allocation3], 16  ;;  %s215_s19 = sphi %s213_s19, %s78_s19  }
  0x28   : > { %206 = vsyncadd [#allocation3], 4294967280  ;;  %s78_s19 = sadd.s32 1, %s215_s19  }
  0x29   : > { %p75_p8 = scmp.ge.s32.totalorder %s78_s19, 16  }
  0x2a   :  { %v82_v1 = vld [vmem:[#allocation2] sm:$0xff] (%p75_p8)  ;;  %vm86_vm0 = vcmask (%p75_p8), 261120   ;;  %v83_v2 = vld [vmem:[#allocation2 + $0x8] sm:$0xff] (%p75_p8)  ;;  %s218_s20 = smov (%p75_p8), [#allocation6]  }
  0x2b   :  { %77 = sbr.rel (!%p75_p8) target bundleno = 39 (0x27), region = 87  ;;  %v84_v3 = vmul.f32 (%p75_p8), 5.656854, %v82_v1  ;;  %v85_v4 = vmul.f32 (%p75_p8), 5.656854, %v83_v2  ;;  %s94_s21 = sshll.u32 (%p75_p8), %s218_s20, 4  ;;  %s95_s21 = int_to_ptr.vmem [resolvable:$true] %s94_s21 }
  0x2c   :  { %s173_s1 = scalar_lea.vmem (%p75_p8), %s95_s21, 256  ;;  %p178_p10 = scmp.lt.s32.totalorder (%p75_p8), %s95_s21, %s95_s21 }
  0x2d   :  { %87 = vst.msk [vmem:[#allocation6] sm:$0xff] (%p75_p8), %vm86_vm0, %v84_v3  ;;  %88 = vst.msk [vmem:[#allocation6 + $0x8] sm:$0xff] (%p75_p8), %vm86_vm0, %v85_v4  ;;  %p174_p9 = scmp.ne.s32.totalorder (%p75_p8), %s95_s21, %s173_s1  ;;  %p179_p11 = scmp.lt.s32.totalorder (%p75_p8), %s173_s1, %s173_s1 }
  0x2f   :  { %p180_p12 = por (%p75_p8), %p179_p11, %p178_p10 }
  0x31   :  { %p181_p13 = pnand (%p75_p8), %p180_p12, %p174_p9 }
  0x33   :  { %184 = shalt.err (!%p181_p13)
}
  0x34   :  { %s185_s24 = scalar_lea.hbm %s256_s2, 256 }
  0x35   :  { %p186_p0 = scmp.ne.s32.totalorder %s256_s2, %s185_s24  ;;  %p189_p1 = scmp.lt.u32.totalorder %s185_s24, %s256_s2 }
  0x37   :  { %p191_p2 = pnand %p189_p1, %p186_p0 }
  0x39   :  { %194 = shalt.err (!%p191_p2)
}
  0x3a   :  { %s219_s29 = smov 128   ;;  %s220_s30 = smov 8  }
  0x3b   :  { %100 = dma.vmem_to_hbm [thread:$0]  %s95_s21, 256, %s256_s2, [#allocation7], %s219_s29, %s219_s29, %s220_s30  }
  0x3c   :  { %207 = dma.done.wait [#allocation7], 256  }
  0x3d   :  { %208 = vsyncadd [#allocation7], 4294967040 }
  0x3e   :  { %104 = vsyncpa [#allocation7], 1 }
  0x3f   :  { %105 = vsyncmov [#allocation3] }
  0x42   :  { %s106_s5 = vpop.sfrf %105 }
  0x43   :  { %p138_p3 = scmp.ne.s32.totalorder %s106_s5, 0 }
  0x45   :  { %110 = shalt.err (%p138_p3)  }

</bundles_post_ra>
